<compile_context>
chip_gen: v5e
topology: v5e:2x2
jax: 0.10.0
libtpu: 0.0.40
codegen_flags: <defaults>
</compile_context>

<pallas_src>
import functools
import math

import jax
import jax.numpy as jnp
from jax.experimental import pallas as pl
from jax.experimental.pallas import tpu as pltpu


_DEFAULT_TM = 256
_VMEM_BUDGET = 24 * 1024 * 1024   # resident-weight footprint cap (safe everywhere)
_VMEM_LIMIT = 32 * 1024 * 1024    # scoped-VMEM limit to request


def _round_up(x, m):
    return ((x + m - 1) // m) * m


def _largest_divisor_tile(dim_pad, cap):
    """Largest multiple of 128 that divides dim_pad and is <= max(cap, 128)."""
    t = min(max(cap, 128), dim_pad)
    t = max((t // 128) * 128, 128)
    while dim_pad % t != 0:
        t -= 128
    return t


def _make_linear_kernel(nk, has_bias, use_acc):
    """Build a kernel specialized on (static) K-step count / bias / scratch."""

    def kernel(*refs):
        if has_bias:
            x_ref, w_ref, b_ref, o_ref, *rest = refs
        else:
            x_ref, w_ref, o_ref, *rest = refs
            b_ref = None
        acc_ref = rest[0] if use_acc else o_ref

        part = jnp.dot(x_ref[...], w_ref[...],
                       preferred_element_type=jnp.float32)

        if nk == 1:
            # Single K step: one store, no RMW passes over the output tile.
            if has_bias:
                part = part + b_ref[...].astype(jnp.float32)
            o_ref[...] = part.astype(o_ref.dtype)
            return

        # Multi K step: program_id only at top level (never inside pl.when).
        k = pl.program_id(2)

        @pl.when(k == 0)
        def _init():
            first = part
            if has_bias:
                first = first + b_ref[...].astype(jnp.float32)
            acc_ref[...] = first

        @pl.when(k > 0)
        def _accum():
            acc_ref[...] += part

        if use_acc:
            @pl.when(k == nk - 1)
            def _finalize():
                o_ref[...] = acc_ref[...].astype(o_ref.dtype)

    return kernel


def my_linear(x, weight, bias=None, *, tm=_DEFAULT_TM, tn=None, tk=None,
              compute_dtype=None):
    """output = x @ weight (+ bias), tiled Pallas TPU kernel.

    Handles ragged M/N/K (M via cdiv grid + masked partial blocks; K/N via
    zero padding of the small operands).  `compute_dtype=jnp.bfloat16`
    optionally casts the matmul operands (f32 accumulation kept).
    """
    M, K = x.shape
    K2, N = weight.shape
    assert K == K2, "in_features mismatch"
    out_dtype = x.dtype
    has_bias = bias is not None
    if has_bias:
        assert bias.shape == (N,)

    if compute_dtype is not None:
        x = x.astype(compute_dtype)
        weight = weight.astype(compute_dtype)

    in_itemsize = jnp.dtype(x.dtype).itemsize
    out_itemsize = jnp.dtype(out_dtype).itemsize
    # sublane packing: 8 rows for 32-bit, 16 for 16-bit, 32 for 8-bit operands
    row_mult = max(8, 8 * (4 // in_itemsize))

    K_pad = _round_up(K, 128)
    N_pad = _round_up(N, 128)

    # ---- tile selection --------------------------------------------------
    tm = _round_up(min(tm, _round_up(M, row_mult)), row_mult)

    user_tiles = (tn is not None) or (tk is not None)
    if user_tiles:
        tn = _largest_divisor_tile(N_pad, tn if tn is not None else N_pad)
        tk = _largest_divisor_tile(K_pad, tk if tk is not None else K_pad)
    else:
        # Weight-resident path: hold the whole weight (and bias) in VMEM,
        # collapse the N/K grid, stream x and the output exactly once.
        resident_bytes = (2 * K_pad * N_pad * in_itemsize      # weight (dbl-buf)
                          + 2 * tm * K_pad * in_itemsize       # x tile
                          + 2 * tm * N_pad * out_itemsize      # out tile
                          + tm * N_pad * 4                     # f32 scratch (worst)
                          + 2 * N_pad * 4)                     # bias
        if resident_bytes <= _VMEM_BUDGET:
            tn, tk = N_pad, K_pad
        else:
            tn = _largest_divisor_tile(N_pad, 512)
            tk = _largest_divisor_tile(K_pad, 512)

    # ---- padding (K for reduction correctness, N for lane-dense output) ---
    if K_pad != K:
        x = jnp.pad(x, ((0, 0), (0, K_pad - K)))
        weight = jnp.pad(weight, ((0, K_pad - K), (0, 0)))
    if N_pad != N:
        weight = jnp.pad(weight, ((0, 0), (0, N_pad - N)))
        if has_bias:
            bias = jnp.pad(bias, (0, N_pad - N))
    if has_bias:
        bias2d = bias.reshape(1, N_pad)

    grid_m = pl.cdiv(M, tm)          # M is NOT padded; last block is masked
    grid_n = N_pad // tn
    grid_k = K_pad // tk
    grid = (grid_m, grid_n, grid_k)
    nk = grid_k

    use_acc = (nk > 1) and (jnp.dtype(out_dtype) != jnp.dtype(jnp.float32))
    kernel = _make_linear_kernel(nk, has_bias, use_acc)

    in_specs = [
        pl.BlockSpec((tm, tk), lambda i, j, k: (i, k)),    # x tile
        pl.BlockSpec((tk, tn), lambda i, j, k: (k, j)),    # weight tile (resident
                                                           # when tn/tk = full dims)
    ]
    inputs = [x, weight]
    if has_bias:
        in_specs.append(pl.BlockSpec((1, tn), lambda i, j, k: (0, j)))
        inputs.append(bias2d)

    scratch_shapes = [pltpu.VMEM((tm, tn), jnp.float32)] if use_acc else []

    # Realistic streamed-bytes estimate under the chosen specs.
    w_passes = 1 if (tk == K_pad and tn == N_pad) else grid_m
    x_passes = grid_n
    cost = pl.CostEstimate(
        flops=2 * M * N_pad * K_pad,
        transcendentals=0,
        bytes_accessed=int(x_passes * M * K_pad * in_itemsize
                           + w_passes * K_pad * N_pad * in_itemsize
                           + M * N_pad * out_itemsize),
    )

    out = pl.pallas_call(
        kernel,
        out_shape=jax.ShapeDtypeStruct((M, N_pad), out_dtype),
        grid_spec=pltpu.PrefetchScalarGridSpec(
            num_scalar_prefetch=0,
            grid=grid,
            in_specs=in_specs,
            out_specs=pl.BlockSpec((tm, tn), lambda i, j, k: (i, j)),
            scratch_shapes=scratch_shapes,
        ),
        compiler_params=pltpu.CompilerParams(
            dimension_semantics=("parallel", "parallel", "arbitrary"),
            vmem_limit_bytes=_VMEM_LIMIT,
        ),
        cost_estimate=cost,
    )(*inputs)

    if N_pad != N:
        out = out[:, :N]
    return out


def init_my_linear_params(key, in_features, out_features, dtype=jnp.float32):
    """Deterministic re-implementation of MyLinear.reset_parameters()."""
    # stdv = 1 / sqrt(weight.T.size(1)) = 1 / sqrt(in_features)
    stdv = 1.0 / math.sqrt(in_features)
    kw, kb = jax.random.split(key)
    weight = jax.random.uniform(
        kw, (in_features, out_features), dtype=dtype, minval=-stdv, maxval=stdv)
    bias = jax.random.uniform(
        kb, (out_features,), dtype=dtype, minval=-stdv, maxval=stdv)
    return weight, bias


if __name__ == "__main__":
    key = jax.random.PRNGKey(0)
    k_x, k_p, k_x2, k_p2 = jax.random.split(key, 4)

    # (1) aligned shapes -> weight-resident, single-K-step kernel
    num_nodes, in_features, out_features = 128, 256, 128
    x = jax.random.normal(k_x, (num_nodes, in_features), dtype=jnp.float32)
    weight, bias = init_my_linear_params(k_p, in_features, out_features)
    out = jax.block_until_ready(my_linear(x, weight, bias))
    ref = x @ weight + bias
    assert out.shape == (num_nodes, out_features)
    assert jnp.allclose(out, ref, atol=2e-2, rtol=2e-2), "case1 mismatch"

    # (2) ragged shapes (M not tile-aligned, K/N not 128-aligned)
    x2 = jax.random.normal(k_x2, (200, 96), dtype=jnp.float32)
    w2, b2 = init_my_linear_params(k_p2, 96, 77)
    out2 = jax.block_until_ready(my_linear(x2, w2, b2))
    ref2 = x2 @ w2 + b2
    assert out2.shape == (200, 77)
    assert jnp.allclose(out2, ref2, atol=2e-2, rtol=2e-2), "case2 mismatch"

    # (3) no-bias path (with_bias=False in the torch module)
    out3 = jax.block_until_ready(my_linear(x, weight, None))
    assert jnp.allclose(out3, x @ weight, atol=2e-2, rtol=2e-2), "case3 mismatch"

    # (4) forced multi-K-step streaming path, f32 direct output accumulation
    out4 = jax.block_until_ready(my_linear(x, weight, bias, tk=128, tn=128))
    assert jnp.allclose(out4, ref, atol=2e-2, rtol=2e-2), "case4 mismatch"

    # (5) multi-K-step with low-precision output -> f32 scratch accumulator
    xb = x.astype(jnp.bfloat16)
    wbf = weight.astype(jnp.bfloat16)
    bbf = bias.astype(jnp.bfloat16)
    out5 = jax.block_until_ready(my_linear(xb, wbf, bbf, tk=128))
    ref5 = (xb.astype(jnp.float32) @ wbf.astype(jnp.float32)
            + bbf.astype(jnp.float32))
    assert out5.dtype == jnp.bfloat16
    assert jnp.allclose(out5.astype(jnp.float32), ref5,
                        atol=1e-1, rtol=1e-1), "case5 mismatch"

    # TODO(synk): torch.spmm (sparse-input) path has no direct Pallas
    # equivalent; only the dense torch.mm path is implemented.
    print("KERNEL_OK")
</pallas_src>

<mosaic_0001>
module attributes {stable_mosaic.version = 11 : i64} {
  func.func @kernel(%arg0: i32, %arg1: i32, %arg2: i32, %arg3: memref<128x256xf32, #tpu.memory_space<vmem>>, %arg4: memref<256x128xf32, #tpu.memory_space<vmem>>, %arg5: memref<1x128xf32, #tpu.memory_space<vmem>>, %arg6: memref<128x128xf32, #tpu.memory_space<vmem>>) attributes {dimension_semantics = [#tpu.dimension_semantics<parallel>, #tpu.dimension_semantics<parallel>, #tpu.dimension_semantics<arbitrary>], iteration_bounds = array<i64: 1, 1, 1>, scalar_prefetch = 0 : i64, scratch_operands = 0 : i64, tpu.core_type = #tpu.core_type<tc>, window_params = [{transform_indices = @transform_0, window_bounds = array<i64: 128, 256>}, {transform_indices = @transform_1, window_bounds = array<i64: 256, 128>}, {transform_indices = @transform_2, window_bounds = array<i64: 1, 128>}, {transform_indices = @transform_3, window_bounds = array<i64: 128, 128>}]} {
    %c0 = arith.constant 0 : index
    %c0_0 = arith.constant 0 : index
    %0 = vector.load %arg3[%c0, %c0_0] : memref<128x256xf32, #tpu.memory_space<vmem>>, vector<128x256xf32>
    %c0_1 = arith.constant 0 : index
    %c0_2 = arith.constant 0 : index
    %1 = vector.load %arg4[%c0_1, %c0_2] : memref<256x128xf32, #tpu.memory_space<vmem>>, vector<256x128xf32>
    %cst = arith.constant dense<0.000000e+00> : vector<128x128xf32>
    %2 = tpu.matmul %0, %1, %cst {dimension_numbers = #tpu.dot_dimension_numbers<[1], [0], [0], [1], [0, 0, 1, 1], [], []>} : vector<128x256xf32>, vector<256x128xf32>, vector<128x128xf32> -> vector<128x128xf32>
    %c0_3 = arith.constant 0 : index
    %c0_4 = arith.constant 0 : index
    %3 = vector.load %arg5[%c0_3, %c0_4] : memref<1x128xf32, #tpu.memory_space<vmem>>, vector<1x128xf32>
    %4 = vector.broadcast %3 : vector<1x128xf32> to vector<128x128xf32>
    %5 = arith.addf %2, %4 : vector<128x128xf32>
    %c0_5 = arith.constant 0 : index
    %c0_6 = arith.constant 0 : index
    %6 = vector.load %arg6[%c0_5, %c0_6] : memref<128x128xf32, #tpu.memory_space<vmem>>, vector<128x128xf32>
    tpu.vector_store %arg6[%c0_5, %c0_6], %5 {strides = array<i32>} : memref<128x128xf32, #tpu.memory_space<vmem>>, vector<128x128xf32>,
    return
  }
  func.func @transform_0(%arg0: i32, %arg1: i32, %arg2: i32) -> (i32, i32) {
    %c0_i32 = arith.constant 0 : i32
    return %arg0, %arg2 : i32, i32
  }
  func.func @transform_1(%arg0: i32, %arg1: i32, %arg2: i32) -> (i32, i32) {
    %c0_i32 = arith.constant 0 : i32
    return %arg2, %arg1 : i32, i32
  }
  func.func @transform_2(%arg0: i32, %arg1: i32, %arg2: i32) -> (i32, i32) {
    %c0_i32 = arith.constant 0 : i32
    %c0_i32_0 = arith.constant 0 : i32
    return %c0_i32, %arg1 : i32, i32
  }
  func.func @transform_3(%arg0: i32, %arg1: i32, %arg2: i32) -> (i32, i32) {
    %c0_i32 = arith.constant 0 : i32
    return %arg0, %arg1 : i32, i32
  }
}

</mosaic_0001>

<bundles_post_ra>
// kernel: tpu_custom_call.1
= control target key start
LH: loop header
LB: loop body
LE: loop exit
PB: predicated region body
PF: predicated region fallthrough
CT: control target
= control target key end

     0   :  { %8 = vsyncpa [#allocation3], 0  ;;  %s462_s0 = inlined_call_operand.hbm [shape: f32[128,256], index: 0, kind: input, shape index: {}]   ;;  %s463_s1 = inlined_call_operand.hbm [shape: f32[256,128], index: 1, kind: input, shape index: {}]   ;;  %s464_s2 = inlined_call_operand.vmem [shape: f32[1,128], index: 2, kind: input, shape index: {}]   ;;  %s465_s3 = inlined_call_operand.hbm [shape: f32[128,128], index: 3, kind: output, shape index: {}]  }
   0x1   :  { %9 = vsyncpa [#allocation6], 0 }
   0x2   :  { %10 = vsyncpa [#allocation4], 0  ;;  %s15_s14 = sshll.u32 %s462_s0, 4  ;;  %s399_s15 = smov [#allocation2]   ;;  %s16_s14 = int_to_ptr.hbm [resolvable:$true] %s15_s14 }
   0x3   :  { %s17_s16 = sshll.u32 %s399_s15, 4  ;;  %s28_s19 = sshll.u32 %s463_s1, 4  ;;  %s18_s16 = int_to_ptr.vmem [resolvable:$true] %s17_s16  ;;  %s29_s19 = int_to_ptr.hbm [resolvable:$true] %s28_s19 }
   0x4   :  { %s400_s20 = smov 256   ;;  %s401_s21 = smov 16  }
   0x5   :  { %23 = dma.hbm_to_vmem [thread:$0]  %s16_s14, 4096, %s18_s16, [#allocation3], %s400_s20, %s400_s20, %s401_s21  }
   0x6   :  { %s402_s22 = smov [#allocation5]   ;;  %s403_s24 = smov 128  }
   0x7   :  { %s30_s23 = sshll.u32 %s402_s22, 4  ;;  %s404_s25 = smov 8   ;;  %s31_s23 = int_to_ptr.vmem [resolvable:$true] %s30_s23 }
   0x8   :  { %36 = dma.hbm_to_vmem [thread:$0]  %s29_s19, 4096, %s31_s23, [#allocation6], %s403_s24, %s403_s24, %s404_s25  }
   0x9   :  { %393 = dma.done.wait [#allocation3], 4096  }
   0xa   :  { %394 = vsyncadd [#allocation3], 4294963200 }
   0xb   :  { %395 = dma.done.wait [#allocation6], 4096  }
   0xc   :  { %396 = vsyncadd [#allocation6], 4294963200  ;;  %v94_v0 = vld [vmem:[#allocation5 + $0x78] sm:$0xff]  ;;  %v93_v1 = vld [vmem:[#allocation5 + $0x70] sm:$0xff]  ;;  %s267_s29 = sshll.u32 %s465_s3, 4  ;;  %s268_s29 = int_to_ptr.hbm [resolvable:$true] %s267_s29 }
   0xd   :  { %v110_v2 = vld [vmem:[#allocation5 + $0xf8] sm:$0xff]  ;;  %281 = vmatpush.msra.mxu2 %v94_v0  ;;  %v109_v3 = vld [vmem:[#allocation5 + $0xf0] sm:$0xff]  ;;  %v92_v4 = vld [vmem:[#allocation5 + $0x68] sm:$0xff]  ;;  %115 = vmatpush.msra.mxu0 %v94_v0 }
   0xe   :  { %297 = vmatpush.msra.mxu3 %v110_v2  ;;  %v108_v5 = vld [vmem:[#allocation5 + $0xe8] sm:$0xff]  ;;  %180 = vmatpush.msra.mxu1 %v110_v2  ;;  %v91_v6 = vld [vmem:[#allocation5 + $0x60] sm:$0xff]  ;;  %v90_v8 = vld [vmem:[#allocation5 + $0x58] sm:$0xff] }
   0xf   :  { %282 = vmatpush.msra.mxu2 %v93_v1  ;;  %116 = vmatpush.msra.mxu0 %v93_v1  ;;  %v107_v7 = vld [vmem:[#allocation5 + $0xe0] sm:$0xff]  ;;  %v106_v9 = vld [vmem:[#allocation5 + $0xd8] sm:$0xff]  ;;  %v89_v10 = vld [vmem:[#allocation5 + $0x50] sm:$0xff] }
  0x10   :  { %298 = vmatpush.msra.mxu3 %v109_v3  ;;  %181 = vmatpush.msra.mxu1 %v109_v3  ;;  %v105_v11 = vld [vmem:[#allocation5 + $0xd0] sm:$0xff]  ;;  %v88_v12 = vld [vmem:[#allocation5 + $0x48] sm:$0xff]  ;;  %v87_v14 = vld [vmem:[#allocation5 + $0x40] sm:$0xff] }
  0x11   :  { %283 = vmatpush.msra.mxu2 %v92_v4  ;;  %117 = vmatpush.msra.mxu0 %v92_v4  ;;  %v104_v13 = vld [vmem:[#allocation5 + $0xc8] sm:$0xff]  ;;  %v103_v15 = vld [vmem:[#allocation5 + $0xc0] sm:$0xff]  ;;  %v86_v16 = vld [vmem:[#allocation5 + $0x38] sm:$0xff] }
  0x12   :  { %299 = vmatpush.msra.mxu3 %v108_v5  ;;  %182 = vmatpush.msra.mxu1 %v108_v5  ;;  %v102_v17 = vld [vmem:[#allocation5 + $0xb8] sm:$0xff]  ;;  %v85_v18 = vld [vmem:[#allocation5 + $0x30] sm:$0xff]  ;;  %v84_v20 = vld [vmem:[#allocation5 + $0x28] sm:$0xff] }
  0x13   :  { %284 = vmatpush.msra.mxu2 %v91_v6  ;;  %118 = vmatpush.msra.mxu0 %v91_v6  ;;  %v101_v19 = vld [vmem:[#allocation5 + $0xb0] sm:$0xff]  ;;  %v100_v21 = vld [vmem:[#allocation5 + $0xa8] sm:$0xff]  ;;  %v83_v22 = vld [vmem:[#allocation5 + $0x20] sm:$0xff] }
  0x14   :  { %300 = vmatpush.msra.mxu3 %v107_v7  ;;  %183 = vmatpush.msra.mxu1 %v107_v7  ;;  %v99_v23 = vld [vmem:[#allocation5 + $0xa0] sm:$0xff]  ;;  %v82_v24 = vld [vmem:[#allocation5 + $0x18] sm:$0xff]  ;;  %v81_v26 = vld [vmem:[#allocation5 + $0x10] sm:$0xff] }
  0x15   :  { %285 = vmatpush.msra.mxu2 %v90_v8  ;;  %119 = vmatpush.msra.mxu0 %v90_v8  ;;  %v98_v25 = vld [vmem:[#allocation5 + $0x98] sm:$0xff]  ;;  %v97_v27 = vld [vmem:[#allocation5 + $0x90] sm:$0xff]  ;;  %v80_v28 = vld [vmem:[#allocation5 + $0x8] sm:$0xff] }
  0x16   :  { %301 = vmatpush.msra.mxu3 %v106_v9  ;;  %184 = vmatpush.msra.mxu1 %v106_v9  ;;  %v96_v29 = vld [vmem:[#allocation5 + $0x88] sm:$0xff]  ;;  %v79_v30 = vld [vmem:[#allocation5] sm:$0xff]  ;;  %v65_v36 = vld [vmem:[#allocation2 + $0x90] sm:$0xff] }
  0x17   :  { %286 = vmatpush.msra.mxu2 %v89_v10  ;;  %120 = vmatpush.msra.mxu0 %v89_v10  ;;  %v95_v31 = vld [vmem:[#allocation5 + $0x80] sm:$0xff]  ;;  %v64_v33 = vld [vmem:[#allocation2 + $0x88] sm:$0xff]  ;;  %v66_v37 = vld [vmem:[#allocation2 + $0x98] sm:$0xff] }
  0x18   :  { %302 = vmatpush.msra.mxu3 %v105_v11  ;;  %185 = vmatpush.msra.mxu1 %v105_v11  ;;  %v63_v32 = vld [vmem:[#allocation2 + $0x80] sm:$0xff]  ;;  %v48_v35 = vld [vmem:[#allocation2 + $0x8] sm:$0xff]  ;;  %v49_v38 = vld [vmem:[#allocation2 + $0x10] sm:$0xff] }
  0x19   :  { %287 = vmatpush.msra.mxu2 %v88_v12  ;;  %121 = vmatpush.msra.mxu0 %v88_v12  ;;  %v47_v34 = vld [vmem:[#allocation2] sm:$0xff]  ;;  %v50_v39 = vld [vmem:[#allocation2 + $0x18] sm:$0xff]  ;;  %v68_v41 = vld [vmem:[#allocation2 + $0xa8] sm:$0xff] }
  0x1a   :  { %303 = vmatpush.msra.mxu3 %v104_v13  ;;  %186 = vmatpush.msra.mxu1 %v104_v13  ;;  %v67_v40 = vld [vmem:[#allocation2 + $0xa0] sm:$0xff]  ;;  %v52_v43 = vld [vmem:[#allocation2 + $0x28] sm:$0xff]  ;;  %v69_v44 = vld [vmem:[#allocation2 + $0xb0] sm:$0xff] }
  0x1b   :  { %288 = vmatpush.msra.mxu2 %v87_v14  ;;  %122 = vmatpush.msra.mxu0 %v87_v14  ;;  %v51_v42 = vld [vmem:[#allocation2 + $0x20] sm:$0xff]  ;;  %v70_v45 = vld [vmem:[#allocation2 + $0xb8] sm:$0xff]  ;;  %v53_v46 = vld [vmem:[#allocation2 + $0x30] sm:$0xff] }
  0x1c   :  { %304 = vmatpush.msra.mxu3 %v103_v15  ;;  %187 = vmatpush.msra.mxu1 %v103_v15  ;;  %v54_v47 = vld [vmem:[#allocation2 + $0x38] sm:$0xff]  ;;  %v71_v48 = vld [vmem:[#allocation2 + $0xc0] sm:$0xff]  ;;  %v72_v49 = vld [vmem:[#allocation2 + $0xc8] sm:$0xff] }
  0x1d   :  { %289 = vmatpush.msra.mxu2 %v86_v16  ;;  %123 = vmatpush.msra.mxu0 %v86_v16  ;;  %v55_v50 = vld [vmem:[#allocation2 + $0x40] sm:$0xff]  ;;  %v56_v51 = vld [vmem:[#allocation2 + $0x48] sm:$0xff]  ;;  %v73_v52 = vld [vmem:[#allocation2 + $0xd0] sm:$0xff] }
  0x1e   :  { %305 = vmatpush.msra.mxu3 %v102_v17  ;;  %188 = vmatpush.msra.mxu1 %v102_v17  ;;  %v74_v53 = vld [vmem:[#allocation2 + $0xd8] sm:$0xff]  ;;  %v57_v54 = vld [vmem:[#allocation2 + $0x50] sm:$0xff]  ;;  %v75_v56 = vld [vmem:[#allocation2 + $0xe0] sm:$0xff] }
  0x1f   :  { %290 = vmatpush.msra.mxu2 %v85_v18  ;;  %124 = vmatpush.msra.mxu0 %v85_v18  ;;  %v58_v55 = vld [vmem:[#allocation2 + $0x58] sm:$0xff]  ;;  %v76_v57 = vld [vmem:[#allocation2 + $0xe8] sm:$0xff]  ;;  %v59_v58 = vld [vmem:[#allocation2 + $0x60] sm:$0xff] }
  0x20   :  { %306 = vmatpush.msra.mxu3 %v101_v19  ;;  %189 = vmatpush.msra.mxu1 %v101_v19  ;;  %v60_v59 = vld [vmem:[#allocation2 + $0x68] sm:$0xff]  ;;  %v77_v60 = vld [vmem:[#allocation2 + $0xf0] sm:$0xff]  ;;  %v78_v61 = vld [vmem:[#allocation2 + $0xf8] sm:$0xff] }
  0x21   :  { %291 = vmatpush.msra.mxu2 %v84_v20  ;;  %125 = vmatpush.msra.mxu0 %v84_v20  ;;  %v61_v62 = vld [vmem:[#allocation2 + $0x70] sm:$0xff]  ;;  %v62_v63 = vld [vmem:[#allocation2 + $0x78] sm:$0xff]  ;;  %v438_v0 = vld [vmem:[%s464_s2] ss:$0 sm:$0xff]  ;;  %s405_s2 = smov [#allocation7]  }
  0x22   :  { %307 = vmatpush.msra.mxu3 %v100_v21  ;;  %190 = vmatpush.msra.mxu1 %v100_v21  ;;  %s265_s26 = sshll.u32 %s405_s2, 4  ;;  %s266_s26 = int_to_ptr.vmem [resolvable:$true] %s265_s26 }
  0x23   :  { %292 = vmatpush.msra.mxu2 %v83_v22  ;;  %126 = vmatpush.msra.mxu0 %v83_v22 }
  0x24   :  { %308 = vmatpush.msra.mxu3 %v99_v23  ;;  %191 = vmatpush.msra.mxu1 %v99_v23 }
  0x25   :  { %293 = vmatpush.msra.mxu2 %v82_v24  ;;  %127 = vmatpush.msra.mxu0 %v82_v24 }
  0x26   :  { %309 = vmatpush.msra.mxu3 %v98_v25  ;;  %192 = vmatpush.msra.mxu1 %v98_v25 }
  0x27   :  { %294 = vmatpush.msra.mxu2 %v81_v26  ;;  %128 = vmatpush.msra.mxu0 %v81_v26 }
  0x28   :  { %310 = vmatpush.msra.mxu3 %v97_v27  ;;  %193 = vmatpush.msra.mxu1 %v97_v27 }
  0x29   :  { %295 = vmatpush.msra.mxu2 %v80_v28  ;;  %129 = vmatpush.msra.mxu0 %v80_v28 }
  0x2a   :  { %311 = vmatpush.msra.mxu3 %v96_v29  ;;  %194 = vmatpush.msra.mxu1 %v96_v29 }
  0x2b   :  { %296 = vmatpush.msra.mxu2 %v79_v30  ;;  %130 = vmatpush.msra.mxu0 %v79_v30 }
  0x2c   :  { %312 = vmatpush.msra.mxu3 %v95_v31  ;;  %155 = vmatmul.f32.vlgmr.msra.gmra.mxu2 %v63_v32 }
  0x2d   :  { %220 = vmatmul.f32.vlgmr.msra.gmra.mxu3 %v64_v33  ;;  %195 = vmatpush.msra.mxu1 %v95_v31 }
  0x2e   :  { %131 = vmatmul.f32.vlgmr.msra.gmra.mxu0 %v47_v34  ;;  %196 = vmatmul.f32.vlgmr.msra.gmra.mxu1 %v48_v35 }
  0x34   :  { %158 = vmatmul.f32.gmra.mxu2 %v65_v36 }
  0x35   :  { %223 = vmatmul.f32.gmra.mxu3 %v66_v37 }
  0x36   :  { %134 = vmatmul.f32.gmra.mxu0 %v49_v38  ;;  %199 = vmatmul.f32.gmra.mxu1 %v50_v39 }
  0x3c   :  { %161 = vmatmul.f32.gmra.mxu2 %v67_v40 }
  0x3d   :  { %226 = vmatmul.f32.gmra.mxu3 %v68_v41 }
  0x3e   :  { %137 = vmatmul.f32.gmra.mxu0 %v51_v42  ;;  %202 = vmatmul.f32.gmra.mxu1 %v52_v43 }
  0x44   :  { %164 = vmatmul.f32.gmra.mxu2 %v69_v44 }
  0x45   :  { %229 = vmatmul.f32.gmra.mxu3 %v70_v45 }
  0x46   :  { %140 = vmatmul.f32.gmra.mxu0 %v53_v46  ;;  %205 = vmatmul.f32.gmra.mxu1 %v54_v47 }
  0x4c   :  { %167 = vmatmul.f32.gmra.mxu2 %v71_v48 }
  0x4d   :  { %232 = vmatmul.f32.gmra.mxu3 %v72_v49 }
  0x4e   :  { %143 = vmatmul.f32.gmra.mxu0 %v55_v50  ;;  %208 = vmatmul.f32.gmra.mxu1 %v56_v51 }
  0x54   :  { %170 = vmatmul.f32.gmra.mxu2 %v73_v52 }
  0x55   :  { %235 = vmatmul.f32.gmra.mxu3 %v74_v53 }
  0x56   :  { %146 = vmatmul.f32.gmra.mxu0 %v57_v54  ;;  %211 = vmatmul.f32.gmra.mxu1 %v58_v55 }
  0x5c   :  { %173 = vmatmul.f32.gmra.mxu2 %v75_v56 }
  0x5d   :  { %238 = vmatmul.f32.gmra.mxu3 %v76_v57 }
  0x5e   :  { %149 = vmatmul.f32.gmra.mxu0 %v59_v58  ;;  %214 = vmatmul.f32.gmra.mxu1 %v60_v59 }
  0x64   :  { %176 = vmatmul.f32.gmra.mxu2 %v77_v60 }
  0x65   :  { %241 = vmatmul.f32.gmra.mxu3 %v78_v61 }
  0x66   :  { %152 = vmatmul.f32.gmra.mxu0 %v61_v62  ;;  %217 = vmatmul.f32.gmra.mxu1 %v62_v63 }
  0xab   :  { %v132_v1 = vpop.f32.mrf.mxu0  ;;  %v197_v2 = vpop.f32.mrf.mxu1 }
  0xac   :  { %v133_v3 = vadd.f32 %v438_v0, %v132_v1 }
  0xae   :  { %v198_v4 = vadd.f32 %v197_v2, %v133_v3 }
  0xaf   :  { %v156_v5 = vpop.f32.mrf.mxu2 }
  0xb0   :  { %v221_v6 = vpop.f32.mrf.mxu3  ;;  %v157_v7 = vadd.f32 %v438_v0, %v156_v5  ;;  %245 = vst [vmem:[#allocation7] sm:$0xff] %v198_v4 }
  0xb2   :  { %v222_v8 = vadd.f32 %v221_v6, %v157_v7 }
  0xb3   :  { %v135_v9 = vpop.f32.mrf.mxu0  ;;  %v200_v10 = vpop.f32.mrf.mxu1 }
  0xb4   :  { %253 = vst [vmem:[#allocation7 + $0x40] sm:$0xff] %v222_v8  ;;  %v136_v11 = vadd.f32 %v438_v0, %v135_v9 }
  0xb6   :  { %v201_v12 = vadd.f32 %v200_v10, %v136_v11 }
  0xb7   :  { %v159_v13 = vpop.f32.mrf.mxu2 }
  0xb8   :  { %v224_v14 = vpop.f32.mrf.mxu3  ;;  %v160_v15 = vadd.f32 %v438_v0, %v159_v13  ;;  %246 = vst [vmem:[#allocation7 + $0x8] sm:$0xff] %v201_v12 }
  0xba   :  { %v225_v16 = vadd.f32 %v224_v14, %v160_v15 }
  0xbb   :  { %v138_v17 = vpop.f32.mrf.mxu0  ;;  %v203_v18 = vpop.f32.mrf.mxu1 }
  0xbc   :  { %254 = vst [vmem:[#allocation7 + $0x48] sm:$0xff] %v225_v16  ;;  %v139_v19 = vadd.f32 %v438_v0, %v138_v17 }
  0xbe   :  { %v204_v20 = vadd.f32 %v203_v18, %v139_v19 }
  0xbf   :  { %v162_v21 = vpop.f32.mrf.mxu2 }
  0xc0   :  { %v227_v22 = vpop.f32.mrf.mxu3  ;;  %v163_v23 = vadd.f32 %v438_v0, %v162_v21  ;;  %247 = vst [vmem:[#allocation7 + $0x10] sm:$0xff] %v204_v20 }
  0xc2   :  { %v228_v24 = vadd.f32 %v227_v22, %v163_v23 }
  0xc3   :  { %v141_v25 = vpop.f32.mrf.mxu0  ;;  %v206_v26 = vpop.f32.mrf.mxu1 }
  0xc4   :  { %255 = vst [vmem:[#allocation7 + $0x50] sm:$0xff] %v228_v24  ;;  %v142_v27 = vadd.f32 %v438_v0, %v141_v25 }
  0xc6   :  { %v207_v28 = vadd.f32 %v206_v26, %v142_v27 }
  0xc7   :  { %v165_v29 = vpop.f32.mrf.mxu2 }
  0xc8   :  { %v230_v30 = vpop.f32.mrf.mxu3  ;;  %v166_v31 = vadd.f32 %v438_v0, %v165_v29  ;;  %248 = vst [vmem:[#allocation7 + $0x18] sm:$0xff] %v207_v28 }
  0xca   :  { %v231_v32 = vadd.f32 %v230_v30, %v166_v31 }
  0xcb   :  { %v144_v33 = vpop.f32.mrf.mxu0  ;;  %v209_v34 = vpop.f32.mrf.mxu1 }
  0xcc   :  { %256 = vst [vmem:[#allocation7 + $0x58] sm:$0xff] %v231_v32  ;;  %v145_v35 = vadd.f32 %v438_v0, %v144_v33 }
  0xce   :  { %v210_v36 = vadd.f32 %v209_v34, %v145_v35 }
  0xcf   :  { %v168_v37 = vpop.f32.mrf.mxu2 }
  0xd0   :  { %v233_v38 = vpop.f32.mrf.mxu3  ;;  %v169_v39 = vadd.f32 %v438_v0, %v168_v37  ;;  %249 = vst [vmem:[#allocation7 + $0x20] sm:$0xff] %v210_v36 }
  0xd2   :  { %v234_v40 = vadd.f32 %v233_v38, %v169_v39 }
  0xd3   :  { %v147_v41 = vpop.f32.mrf.mxu0  ;;  %v212_v42 = vpop.f32.mrf.mxu1 }
  0xd4   :  { %257 = vst [vmem:[#allocation7 + $0x60] sm:$0xff] %v234_v40  ;;  %v148_v43 = vadd.f32 %v438_v0, %v147_v41 }
  0xd6   :  { %v213_v44 = vadd.f32 %v212_v42, %v148_v43 }
  0xd7   :  { %v171_v45 = vpop.f32.mrf.mxu2 }
  0xd8   :  { %v236_v46 = vpop.f32.mrf.mxu3  ;;  %v172_v47 = vadd.f32 %v438_v0, %v171_v45  ;;  %250 = vst [vmem:[#allocation7 + $0x28] sm:$0xff] %v213_v44 }
  0xda   :  { %v237_v48 = vadd.f32 %v236_v46, %v172_v47 }
  0xdb   :  { %v150_v49 = vpop.f32.mrf.mxu0  ;;  %v215_v50 = vpop.f32.mrf.mxu1 }
  0xdc   :  { %258 = vst [vmem:[#allocation7 + $0x68] sm:$0xff] %v237_v48  ;;  %v151_v51 = vadd.f32 %v438_v0, %v150_v49 }
  0xde   :  { %v216_v52 = vadd.f32 %v215_v50, %v151_v51 }
  0xdf   :  { %v174_v53 = vpop.f32.mrf.mxu2 }
  0xe0   :  { %v239_v54 = vpop.f32.mrf.mxu3  ;;  %v175_v55 = vadd.f32 %v438_v0, %v174_v53  ;;  %251 = vst [vmem:[#allocation7 + $0x30] sm:$0xff] %v216_v52 }
  0xe2   :  { %v240_v56 = vadd.f32 %v239_v54, %v175_v55 }
  0xe3   :  { %v153_v57 = vpop.f32.mrf.mxu0  ;;  %v218_v58 = vpop.f32.mrf.mxu1 }
  0xe4   :  { %259 = vst [vmem:[#allocation7 + $0x70] sm:$0xff] %v240_v56  ;;  %v154_v59 = vadd.f32 %v438_v0, %v153_v57 }
  0xe6   :  { %v219_v60 = vadd.f32 %v218_v58, %v154_v59 }
  0xe7   :  { %v177_v61 = vpop.f32.mrf.mxu2 }
  0xe8   :  { %v242_v62 = vpop.f32.mrf.mxu3  ;;  %v178_v63 = vadd.f32 %v438_v0, %v177_v61  ;;  %252 = vst [vmem:[#allocation7 + $0x38] sm:$0xff] %v219_v60 }
  0xea   :  { %v243_v1 = vadd.f32 %v242_v62, %v178_v63 }
  0xec   :  { %260 = vst [vmem:[#allocation7 + $0x78] sm:$0xff] %v243_v1 }
  0xed   :  { %273 = dma.vmem_to_hbm [thread:$0]  %s266_s26, 2048, %s268_s29, [#allocation4], %s403_s24, %s403_s24, %s404_s25  }
  0xee   :  { %397 = dma.done.wait [#allocation4], 2048  }
  0xef   :  { %398 = vsyncadd [#allocation4], 4294965248 }
  0xf0   :  { %278 = vsyncpa [#allocation3], 1 }
  0xf1   :  { %279 = vsyncpa [#allocation6], 1 }
  0xf2   :  { %280 = vsyncpa [#allocation4], 1 }

</bundles_post_ra>
